<compile_context>
chip_gen: v6e
topology: v6e:2x2x1
jax: 0.10.0
libtpu: 0.0.40
codegen_flags: <defaults>
</compile_context>

<pallas_src>
import jax
import jax.numpy as jnp
from jax.experimental import pallas as pl
from jax.experimental.pallas import tpu as pltpu

LANES = 128
CHUNK_ROWS = 128               # rows per inner accumulation chunk (~64 KiB f32 temporaries)
TARGET_TILE_BYTES = 4 << 20    # ~4 MiB of the widest input stream per grid step
NEG_MASK = -1e30               # logit substitute for masked rows -> contributes exactly 0


def _round_up(x, m):
    return ((x + m - 1) // m) * m


def _round_down(x, m):
    return (x // m) * m


def _make_kernel(total_rows, block_rows, chunk_rows, blocks_per_shard, ragged):
    """Build the reduction kernel for a fixed (static) tiling configuration."""
    n_chunks = block_rows // chunk_rows
    folds = chunk_rows // 8

    def _contrib(x, t):
        # p = sigmoid(x) (1 EUP, tanh-lowered); log(p) (1 EUP).
        # log(1-p) via the identity log(1-sigmoid(x)) = log(sigmoid(x)) - x,
        # clamped to [-100, 0]; using the clamped log_p keeps the extreme
        # negative / padded logits (p == 0) contributing exactly 0 to bce.
        p = jax.nn.sigmoid(x)
        log_p = jnp.maximum(jnp.log(p), -100.0)
        log_1mp = jnp.maximum(jnp.minimum(log_p - x, 0.0), -100.0)
        # -(t*log_p + (1-t)*log_1mp) rewritten with one multiply.
        bce = t * (log_1mp - log_p) - log_1mp
        return p * t, p + t, bce

    def _fold(v):
        # (chunk_rows, 128) -> (8, 128): sublane-tile-aligned reshape + VPU adds.
        return v.reshape(folds, 8, LANES).sum(axis=0)

    def _accumulate(x_ref, t_ref, acc_ref, row_start, masked):
        def body(c, carry):
            acc_i, acc_t, acc_b = carry
            r0 = pl.multiple_of(c * chunk_rows, chunk_rows)
            x = x_ref[pl.ds(r0, chunk_rows), :].astype(jnp.float32)
            t = t_ref[pl.ds(r0, chunk_rows), :].astype(jnp.float32)
            if masked:
                # Only the (at most one per shard) boundary block runs this path.
                rows_left = total_rows - row_start - r0
                ridx = jax.lax.broadcasted_iota(jnp.int32, (chunk_rows, LANES), 0)
                keep = ridx < rows_left
                x = jnp.where(keep, x, NEG_MASK)   # sigmoid -> 0, bce -> 0
                t = jnp.where(keep, t, 0.0)
            pt, ps, bc = _contrib(x, t)
            return acc_i + _fold(pt), acc_t + _fold(ps), acc_b + _fold(bc)

        zero = jnp.zeros((8, LANES), jnp.float32)
        acc_i, acc_t, acc_b = jax.lax.fori_loop(0, n_chunks, body, (zero, zero, zero))
        acc_ref[0] += acc_i
        acc_ref[1] += acc_t
        acc_ref[2] += acc_b

    def kernel(x_ref, t_ref, o_ref, acc_ref):
        s = pl.program_id(0)
        i = pl.program_id(1)

        @pl.when(i == 0)
        def _():
            acc_ref[...] = jnp.zeros_like(acc_ref)

        row_start = (s * blocks_per_shard + i) * block_rows

        if ragged:
            is_partial = row_start + block_rows > total_rows

            @pl.when(jnp.logical_not(is_partial))
            def _():
                _accumulate(x_ref, t_ref, acc_ref, row_start, masked=False)

            @pl.when(is_partial)
            def _():
                _accumulate(x_ref, t_ref, acc_ref, row_start, masked=True)
        else:
            _accumulate(x_ref, t_ref, acc_ref, row_start, masked=False)

        @pl.when(i == pl.num_programs(1) - 1)
        def _():
            o_ref[0] = acc_ref[...]

    return kernel


def bce_iou_loss(logits, targets, smooth=1.0):
    """Pallas TPU implementation of BCE_IoULoss.forward(inputs, targets)."""
    n_elems = logits.size
    x = logits.reshape(-1)
    t = targets.reshape(-1)

    if not jnp.issubdtype(x.dtype, jnp.inexact):
        x = x.astype(jnp.float32)

    # Sub-32-bit dtypes pack along sublanes; keep rows aligned per dtype.
    row_align = max(32 // x.dtype.itemsize, 32 // t.dtype.itemsize, 8)
    align_elems = LANES * row_align

    pad = (-n_elems) % align_elems
    if pad:
        # Only misaligned sizes (numel % (128*row_align) != 0) pay this copy;
        # aligned sizes stream zero-copy.  Padded logits get the most negative
        # finite value (sigmoid -> 0, bce -> 0) and targets 0, so the tail
        # contributes exactly nothing.
        neg = jnp.finfo(x.dtype).min
        x = jnp.pad(x, (0, pad), constant_values=neg)
        t = jnp.pad(t, (0, pad))

    rows = (n_elems + pad) // LANES
    x2 = x.reshape(rows, LANES)
    t2 = t.reshape(rows, LANES)

    # Dtype-scaled tile: fixed byte budget per DMA step for the widest stream.
    max_item = max(x2.dtype.itemsize, t2.dtype.itemsize)
    target_rows = _round_down(
        max(TARGET_TILE_BYTES // (LANES * max_item), CHUNK_ROWS), CHUNK_ROWS
    )
    if rows >= CHUNK_ROWS:
        block_rows = min(target_rows, _round_down(rows, CHUNK_ROWS))
        chunk_rows = CHUNK_ROWS
    else:
        block_rows = rows          # equals the full row dim -> always legal
        chunk_rows = rows          # multiple of row_align >= 8

    blocks_total = pl.cdiv(rows, block_rows)
    num_shards = 2 if blocks_total >= 2 else 1
    blocks_per_shard = pl.cdiv(blocks_total, num_shards)
    ragged = (rows % block_rows != 0) or (num_shards * blocks_per_shard != blocks_total)
    last_block = blocks_total - 1

    # Clamp so no DMA window starts past the array; logically-OOB blocks are
    # fully masked inside the kernel (they re-read the last block, contribute 0).
    def in_index(s, i):
        return (jnp.minimum(s * blocks_per_shard + i, last_block), 0)

    in_spec = pl.BlockSpec((block_rows, LANES), in_index)

    kernel = _make_kernel(rows, block_rows, chunk_rows, blocks_per_shard, ragged)

    in_tile_bytes = block_rows * LANES * (x2.dtype.itemsize + t2.dtype.itemsize)
    vmem_limit = int(min(100 << 20, 2 * in_tile_bytes + (12 << 20)))

    parts = pl.pallas_call(
        kernel,
        out_shape=jax.ShapeDtypeStruct((num_shards, 3, 8, LANES), jnp.float32),
        grid_spec=pltpu.PrefetchScalarGridSpec(
            num_scalar_prefetch=0,
            grid=(num_shards, blocks_per_shard),
            in_specs=[in_spec, in_spec],
            out_specs=pl.BlockSpec((1, 3, 8, LANES), lambda s, i: (s, 0, 0, 0)),
            scratch_shapes=[pltpu.VMEM((3, 8, LANES), jnp.float32)],
        ),
        compiler_params=pltpu.CompilerParams(
            dimension_semantics=("parallel", "arbitrary"),
            vmem_limit_bytes=vmem_limit,
        ),
    )(x2, t2)

    # Tiny finalization in the wrapper: (num_shards, 3, 8, 128) -> 3 scalars.
    sums = jnp.sum(parts, axis=(0, 2, 3))
    inter, total, bce_sum = sums[0], sums[1], sums[2]
    union = total - inter
    iou = (inter + smooth) / (union + smooth)
    return (1.0 - iou) + bce_sum / n_elems


def _reference(logits, targets, smooth=1.0):
    """Faithful (torch-style) formula for verification."""
    p = jax.nn.sigmoid(logits.astype(jnp.float32)).ravel()
    t = targets.astype(jnp.float32).ravel()
    inter = jnp.sum(p * t)
    total = jnp.sum(p + t)
    union = total - inter
    iou = (inter + smooth) / (union + smooth)
    log_p = jnp.maximum(jnp.log(p), -100.0)
    log_1mp = jnp.maximum(jnp.log1p(-p), -100.0)
    bce = jnp.mean(-(t * log_p + (1.0 - t) * log_1mp))
    return (1.0 - iou) + bce


if __name__ == "__main__":
    key = jax.random.PRNGKey(0)

    def check(shape, k):
        k1, k2 = jax.random.split(k)
        logits = jax.random.normal(k1, shape, dtype=jnp.float32)
        targets = (jax.random.uniform(k2, shape) > 0.5).astype(jnp.float32)
        loss = jax.block_until_ready(bce_iou_loss(logits, targets, smooth=1.0))
        ref = jax.block_until_ready(_reference(logits, targets, smooth=1.0))
        assert jnp.allclose(loss, ref, rtol=1e-4, atol=1e-5), (shape, loss, ref)

    k1, k2, k3 = jax.random.split(key, 3)
    check((2, 4, 16, 16), k1)   # N=2, C=4, 16x16: aligned, zero-copy fast path
    check((2, 4, 40, 80), k2)   # multi-block, 2 shards, in-kernel masked ragged tail
    check((1, 1, 30, 33), k3)   # numel % 1024 != 0 -> minimal wrapper pad path
    print("KERNEL_OK")
</pallas_src>

<mosaic_0001>
module attributes {stable_mosaic.version = 11 : i64} {
  func.func @kernel(%arg0: i32, %arg1: i32, %arg2: memref<16x128xf32, #tpu.memory_space<vmem>>, %arg3: memref<16x128xf32, #tpu.memory_space<vmem>>, %arg4: memref<1x3x8x128xf32, #tpu.memory_space<vmem>>, %arg5: memref<3x8x128xf32, #tpu.memory_space<vmem>>) attributes {dimension_semantics = [#tpu.dimension_semantics<parallel>, #tpu.dimension_semantics<arbitrary>], iteration_bounds = array<i64: 1, 1>, scalar_prefetch = 0 : i64, scratch_operands = 1 : i64, tpu.core_type = #tpu.core_type<tc>, window_params = [{transform_indices = @transform_0, window_bounds = array<i64: 16, 128>}, {transform_indices = @transform_1, window_bounds = array<i64: 16, 128>}, {transform_indices = @transform_2, window_bounds = array<i64: 1, 3, 8, 128>}]} {
    %c0_i32 = arith.constant 0 : i32
    %0 = arith.cmpi eq, %arg1, %c0_i32 : i32
    %1 = arith.extui %0 : i1 to i32
    %c0_i32_0 = arith.constant 0 : i32
    %2 = arith.cmpi ne, %1, %c0_i32_0 : i32
    scf.if %2 {
      %cst_28 = arith.constant 0.000000e+00 : f32
      %58 = vector.broadcast %cst_28 : f32 to vector<3x8x128xf32>
      %c0_29 = arith.constant 0 : index
      %c0_30 = arith.constant 0 : index
      %c0_31 = arith.constant 0 : index
      %59 = vector.load %arg5[%c0_29, %c0_30, %c0_31] : memref<3x8x128xf32, #tpu.memory_space<vmem>>, vector<3x8x128xf32>
      tpu.vector_store %arg5[%c0_29, %c0_30, %c0_31], %58 {strides = array<i32>} : memref<3x8x128xf32, #tpu.memory_space<vmem>>, vector<3x8x128xf32>,
    } else {
    }
    %cst = arith.constant 0.000000e+00 : f32
    %3 = vector.broadcast %cst : f32 to vector<8x128xf32>
    %c0_i32_1 = arith.constant 0 : i32
    %c16_i32 = arith.constant 16 : i32
    %4 = arith.muli %c0_i32_1, %c16_i32 : i32
    %5 = tpu.assume_multiple %4, 16 : i32
    %6 = arith.index_cast %5 : i32 to index
    %c0 = arith.constant 0 : index
    %7 = vector.load %arg2[%6, %c0] : memref<16x128xf32, #tpu.memory_space<vmem>>, vector<16x128xf32>
    %8 = arith.index_cast %5 : i32 to index
    %c0_2 = arith.constant 0 : index
    %9 = vector.load %arg3[%8, %c0_2] : memref<16x128xf32, #tpu.memory_space<vmem>>, vector<16x128xf32>
    %10 = arith.negf %7 : vector<16x128xf32>
    %11 = math.exp %10 : vector<16x128xf32>
    %cst_3 = arith.constant 1.000000e+00 : f32
    %12 = vector.broadcast %cst_3 : f32 to vector<16x128xf32>
    %13 = arith.addf %12, %11 : vector<16x128xf32>
    %14 = arith.divf %12, %13 : vector<16x128xf32>
    %15 = math.log %14 : vector<16x128xf32>
    %cst_4 = arith.constant -1.000000e+02 : f32
    %16 = vector.broadcast %cst_4 : f32 to vector<16x128xf32>
    %17 = arith.maximumf %15, %16 : vector<16x128xf32>
    %18 = arith.subf %17, %7 : vector<16x128xf32>
    %cst_5 = arith.constant 0.000000e+00 : f32
    %19 = vector.broadcast %cst_5 : f32 to vector<16x128xf32>
    %20 = arith.minimumf %18, %19 : vector<16x128xf32>
    %cst_6 = arith.constant -1.000000e+02 : f32
    %21 = vector.broadcast %cst_6 : f32 to vector<16x128xf32>
    %22 = arith.maximumf %20, %21 : vector<16x128xf32>
    %23 = arith.subf %22, %17 : vector<16x128xf32>
    %24 = arith.mulf %9, %23 : vector<16x128xf32>
    %25 = arith.subf %24, %22 : vector<16x128xf32>
    %26 = arith.mulf %14, %9 : vector<16x128xf32>
    %27 = arith.addf %14, %9 : vector<16x128xf32>
    %28 = vector.shape_cast %26 : vector<16x128xf32> to vector<2x8x128xf32>
    %cst_7 = arith.constant dense<0.000000e+00> : vector<8x128xf32>
    %29 = vector.multi_reduction <add>, %28, %cst_7 [0] : vector<2x8x128xf32> to vector<8x128xf32>
    %30 = arith.addf %3, %29 : vector<8x128xf32>
    %31 = vector.shape_cast %27 : vector<16x128xf32> to vector<2x8x128xf32>
    %cst_8 = arith.constant dense<0.000000e+00> : vector<8x128xf32>
    %32 = vector.multi_reduction <add>, %31, %cst_8 [0] : vector<2x8x128xf32> to vector<8x128xf32>
    %33 = arith.addf %3, %32 : vector<8x128xf32>
    %34 = vector.shape_cast %25 : vector<16x128xf32> to vector<2x8x128xf32>
    %cst_9 = arith.constant dense<0.000000e+00> : vector<8x128xf32>
    %35 = vector.multi_reduction <add>, %34, %cst_9 [0] : vector<2x8x128xf32> to vector<8x128xf32>
    %36 = arith.addf %3, %35 : vector<8x128xf32>
    %c1_i32 = arith.constant 1 : i32
    %c0_10 = arith.constant 0 : index
    %c0_11 = arith.constant 0 : index
    %c0_12 = arith.constant 0 : index
    %37 = vector.load %arg5[%c0_10, %c0_11, %c0_12] : memref<3x8x128xf32, #tpu.memory_space<vmem>>, vector<1x8x128xf32>
    %38 = vector.shape_cast %37 : vector<1x8x128xf32> to vector<8x128xf32>
    %39 = arith.addf %38, %30 : vector<8x128xf32>
    %c0_13 = arith.constant 0 : index
    %c0_14 = arith.constant 0 : index
    %c0_15 = arith.constant 0 : index
    %40 = vector.load %arg5[%c0_13, %c0_14, %c0_15] : memref<3x8x128xf32, #tpu.memory_space<vmem>>, vector<1x8x128xf32>
    %41 = vector.shape_cast %40 : vector<1x8x128xf32> to vector<8x128xf32>
    %42 = vector.shape_cast %39 : vector<8x128xf32> to vector<1x8x128xf32>
    tpu.vector_store %arg5[%c0_13, %c0_14, %c0_15], %42 {strides = array<i32>} : memref<3x8x128xf32, #tpu.memory_space<vmem>>, vector<1x8x128xf32>,
    %c1 = arith.constant 1 : index
    %c0_16 = arith.constant 0 : index
    %c0_17 = arith.constant 0 : index
    %43 = vector.load %arg5[%c1, %c0_16, %c0_17] : memref<3x8x128xf32, #tpu.memory_space<vmem>>, vector<1x8x128xf32>
    %44 = vector.shape_cast %43 : vector<1x8x128xf32> to vector<8x128xf32>
    %45 = arith.addf %44, %33 : vector<8x128xf32>
    %c1_18 = arith.constant 1 : index
    %c0_19 = arith.constant 0 : index
    %c0_20 = arith.constant 0 : index
    %46 = vector.load %arg5[%c1_18, %c0_19, %c0_20] : memref<3x8x128xf32, #tpu.memory_space<vmem>>, vector<1x8x128xf32>
    %47 = vector.shape_cast %46 : vector<1x8x128xf32> to vector<8x128xf32>
    %48 = vector.shape_cast %45 : vector<8x128xf32> to vector<1x8x128xf32>
    tpu.vector_store %arg5[%c1_18, %c0_19, %c0_20], %48 {strides = array<i32>} : memref<3x8x128xf32, #tpu.memory_space<vmem>>, vector<1x8x128xf32>,
    %c2 = arith.constant 2 : index
    %c0_21 = arith.constant 0 : index
    %c0_22 = arith.constant 0 : index
    %49 = vector.load %arg5[%c2, %c0_21, %c0_22] : memref<3x8x128xf32, #tpu.memory_space<vmem>>, vector<1x8x128xf32>
    %50 = vector.shape_cast %49 : vector<1x8x128xf32> to vector<8x128xf32>
    %51 = arith.addf %50, %36 : vector<8x128xf32>
    %c2_23 = arith.constant 2 : index
    %c0_24 = arith.constant 0 : index
    %c0_25 = arith.constant 0 : index
    %52 = vector.load %arg5[%c2_23, %c0_24, %c0_25] : memref<3x8x128xf32, #tpu.memory_space<vmem>>, vector<1x8x128xf32>
    %53 = vector.shape_cast %52 : vector<1x8x128xf32> to vector<8x128xf32>
    %54 = vector.shape_cast %51 : vector<8x128xf32> to vector<1x8x128xf32>
    tpu.vector_store %arg5[%c2_23, %c0_24, %c0_25], %54 {strides = array<i32>} : memref<3x8x128xf32, #tpu.memory_space<vmem>>, vector<1x8x128xf32>,
    %c0_i32_26 = arith.constant 0 : i32
    %55 = arith.cmpi eq, %arg1, %c0_i32_26 : i32
    %56 = arith.extui %55 : i1 to i32
    %c0_i32_27 = arith.constant 0 : i32
    %57 = arith.cmpi ne, %56, %c0_i32_27 : i32
    scf.if %57 {
      %c0_28 = arith.constant 0 : index
      %c0_29 = arith.constant 0 : index
      %c0_30 = arith.constant 0 : index
      %58 = vector.load %arg5[%c0_28, %c0_29, %c0_30] : memref<3x8x128xf32, #tpu.memory_space<vmem>>, vector<3x8x128xf32>
      %c0_31 = arith.constant 0 : index
      %c0_32 = arith.constant 0 : index
      %c0_33 = arith.constant 0 : index
      %c0_34 = arith.constant 0 : index
      %59 = vector.load %arg4[%c0_31, %c0_32, %c0_33, %c0_34] : memref<1x3x8x128xf32, #tpu.memory_space<vmem>>, vector<1x3x8x128xf32>
      %60 = vector.shape_cast %59 : vector<1x3x8x128xf32> to vector<3x8x128xf32>
      %61 = vector.shape_cast %58 : vector<3x8x128xf32> to vector<1x3x8x128xf32>
      tpu.vector_store %arg4[%c0_31, %c0_32, %c0_33, %c0_34], %61 {strides = array<i32>} : memref<1x3x8x128xf32, #tpu.memory_space<vmem>>, vector<1x3x8x128xf32>,
    } else {
    }
    return
  }
  func.func @transform_0(%arg0: i32, %arg1: i32) -> (i32, i32) {
    %c1_i32 = arith.constant 1 : i32
    %0 = arith.muli %arg0, %c1_i32 : i32
    %1 = arith.addi %0, %arg1 : i32
    %c0_i32 = arith.constant 0 : i32
    %2 = arith.minsi %1, %c0_i32 : i32
    %c0_i32_0 = arith.constant 0 : i32
    %c0_i32_1 = arith.constant 0 : i32
    return %2, %c0_i32_0 : i32, i32
  }
  func.func @transform_1(%arg0: i32, %arg1: i32) -> (i32, i32) {
    %c1_i32 = arith.constant 1 : i32
    %0 = arith.muli %arg0, %c1_i32 : i32
    %1 = arith.addi %0, %arg1 : i32
    %c0_i32 = arith.constant 0 : i32
    %2 = arith.minsi %1, %c0_i32 : i32
    %c0_i32_0 = arith.constant 0 : i32
    %c0_i32_1 = arith.constant 0 : i32
    return %2, %c0_i32_0 : i32, i32
  }
  func.func @transform_2(%arg0: i32, %arg1: i32) -> (i32, i32, i32, i32) {
    %c0_i32 = arith.constant 0 : i32
    %c0_i32_0 = arith.constant 0 : i32
    %c0_i32_1 = arith.constant 0 : i32
    %c0_i32_2 = arith.constant 0 : i32
    return %arg0, %c0_i32, %c0_i32_0, %c0_i32_1 : i32, i32, i32, i32
  }
}

</mosaic_0001>

<bundles_post_ra>
// kernel: tpu_custom_call.1
= control target key start
LH: loop header
LB: loop body
LE: loop exit
PB: predicated region body
PF: predicated region fallthrough
CT: control target
= control target key end

     0   :  { %7 = vsyncpa [#allocation4], 0  ;;  %s276_s0 = inlined_call_operand.hbm [shape: f32[16,128], index: 0, kind: input, shape index: {}]   ;;  %s277_s1 = inlined_call_operand.hbm [shape: f32[16,128], index: 1, kind: input, shape index: {}]   ;;  %s278_s2 = inlined_call_operand.hbm [shape: f32[1,3,8,128], index: 2, kind: output, shape index: {}]  }
   0x1   :  { %8 = vsyncpa [#allocation7], 0 }
   0x2   :  { %9 = vsyncpa [#allocation5], 0  ;;  %s238_s9 = smov [#allocation3]  }
   0x3   :  { %s21_s10 = sshll.u32 %s238_s9, 4  ;;  %s22_s10 = int_to_ptr.vmem [resolvable:$true] %s21_s10 }
   0x4   :  { %s180_s11 = scalar_lea.vmem %s22_s10, 256  ;;  %p185_p1 = scmp.lt.s32.totalorder %s22_s10, %s22_s10 }
   0x5   :  { %p181_p0 = scmp.ne.s32.totalorder %s22_s10, %s180_s11  ;;  %p186_p2 = scmp.lt.s32.totalorder %s180_s11, %s180_s11 }
   0x7   :  { %p187_p3 = por %p186_p2, %p185_p1 }
   0x9   :  { %p188_p4 = pnand %p187_p3, %p181_p0 }
   0xb   :  { %191 = shalt.err (!%p188_p4)
}
   0xc   :  { %s239_s12 = smov 128   ;;  %s240_s13 = smov 8  }
   0xd   :  { %27 = dma.hbm_to_vmem [thread:$0]  %s276_s0, 256, %s22_s10, [#allocation4], %s239_s12, %s239_s12, %s240_s13  }
   0xe   :  { %s241_s16 = smov [#allocation6]  }
   0xf   :  { %s39_s17 = sshll.u32 %s241_s16, 4  ;;  %s40_s17 = int_to_ptr.vmem [resolvable:$true] %s39_s17 }
  0x10   :  { %s200_s18 = scalar_lea.vmem %s40_s17, 256  ;;  %p205_p6 = scmp.lt.s32.totalorder %s40_s17, %s40_s17 }
  0x11   :  { %p201_p5 = scmp.ne.s32.totalorder %s40_s17, %s200_s18  ;;  %p206_p7 = scmp.lt.s32.totalorder %s200_s18, %s200_s18 }
  0x13   :  { %p207_p8 = por %p206_p7, %p205_p6 }
  0x15   :  { %p208_p9 = pnand %p207_p8, %p201_p5 }
  0x17   :  { %211 = shalt.err (!%p208_p9)
}
  0x18   :  { %45 = dma.hbm_to_vmem [thread:$0]  %s277_s1, 256, %s40_s17, [#allocation7], %s239_s12, %s239_s12, %s240_s13  }
  0x19   :  { %232 = dma.done.wait [#allocation4], 256  }
  0x1a   :  { %233 = vsyncadd [#allocation4], 4294967040 }
  0x1b   :  { %234 = dma.done.wait [#allocation7], 256  }
  0x1c   :  { %235 = vsyncadd [#allocation7], 4294967040  ;;  %v67_v0 = vld [vmem:[#allocation3] sm:$0xff]  ;;  %v68_v1 = vld [vmem:[#allocation3 + $0x8] sm:$0xff]  ;;  %s242_s0 = smov [#allocation8]  }
  0x1d   :  { %v153_v2 = vmul.f32 -1.442695, %v67_v0  ;;  %v154_v3 = vmul.f32 -1.442695, %v68_v1  ;;  %v69_v9 = vld [vmem:[#allocation6] sm:$0xff]  ;;  %v70_v11 = vld [vmem:[#allocation6 + $0x8] sm:$0xff] }
  0x1e   :  { %s136_s1 = sshll.u32 %s242_s0, 4  ;;  %s137_s1 = int_to_ptr.vmem [resolvable:$true] %s136_s1 }
  0x1f   :  { %160 = vpow2.f32 %v153_v2  ;;  %s212_s21 = scalar_lea.vmem %s137_s1, 384  ;;  %p217_p11 = scmp.lt.s32.totalorder %s137_s1, %s137_s1 }
  0x20   :  { %162 = vpow2.f32 %v154_v3  ;;  %p213_p10 = scmp.ne.s32.totalorder %s137_s1, %s212_s21  ;;  %p218_p12 = scmp.lt.s32.totalorder %s212_s21, %s212_s21 }
  0x22   :  { %p219_p13 = por %p218_p12, %p217_p11 }
  0x24   :  { %p220_p0 = pnand %p219_p13, %p213_p10 }
  0x2c   :  { %v161_v4 = vpop.eup %160 }
  0x2d   :  { %v163_v5 = vpop.eup %162  ;;  %v77_v6 = vadd.f32 1.0, %v161_v4 }
  0x2e   :  { %v78_v7 = vadd.f32 1.0, %v163_v5 }
  0x2f   :  { %164 = vrcp.f32 %v77_v6 }
  0x30   :  { %166 = vrcp.f32 %v78_v7 }
  0x3c   :  { %v165_v8 = vpop.eup %164 }
  0x3d   :  { %v167_v10 = vpop.eup %166  ;;  %v101_v12 = vmul.f32 %v165_v8, %v69_v9  ;;  %v103_v13 = vadd.f32 %v165_v8, %v69_v9  ;;  %168 = vlog2.f32 %v165_v8 }
  0x3e   :  { %v102_v14 = vmul.f32 %v167_v10, %v70_v11  ;;  %v104_v15 = vadd.f32 %v167_v10, %v70_v11  ;;  %170 = vlog2.f32 %v167_v10 }
  0x40   :  { %v105_v16 = vadd.f32 %v102_v14, %v101_v12  ;;  %v107_v17 = vadd.f32 %v104_v15, %v103_v13 }
  0x42   :  { %128 = vst [vmem:[#allocation8] sm:$0xff] %v105_v16  ;;  %129 = vst [vmem:[#allocation8 + $0x8] sm:$0xff] %v107_v17 }
  0x4a   :  { %v169_v18 = vpop.eup %168 }
  0x4b   :  { %v171_v19 = vpop.eup %170  ;;  %v84_v20 = vmul.f32 0.6931472, %v169_v18 }
  0x4c   :  { %v86_v21 = vmul.f32 0.6931472, %v171_v19 }
  0x4d   :  { %v87_v22 = vmax.f32 %v84_v20, -100.0 }
  0x4e   :  { %v88_v23 = vmax.f32 %v86_v21, -100.0 }
  0x4f   :  { %v89_v24 = vsub.f32 %v87_v22, %v67_v0 }
  0x50   :  { %v90_v25 = vsub.f32 %v88_v23, %v68_v1 }
  0x51   :  { %v91_v26 = vmin.f32 %v89_v24, 0.0 }
  0x52   :  { %v92_v27 = vmin.f32 %v90_v25, 0.0 }
  0x53   :  { %v93_v28 = vmax.f32 %v91_v26, -100.0 }
  0x54   :  { %v94_v29 = vmax.f32 %v92_v27, -100.0 }
  0x55   :  { %v95_v30 = vsub.f32 %v93_v28, %v87_v22 }
  0x56   :  { %v96_v31 = vsub.f32 %v94_v29, %v88_v23 }
  0x57   :  { %v97_v32 = vmul.f32 %v95_v30, %v69_v9 }
  0x58   :  { %v98_v33 = vmul.f32 %v96_v31, %v70_v11 }
  0x59   :  { %v99_v34 = vsub.f32 %v97_v32, %v93_v28 }
  0x5a   :  { %v100_v35 = vsub.f32 %v98_v33, %v94_v29 }
  0x5c   :  { %v109_v36 = vadd.f32 %v100_v35, %v99_v34 }
  0x5e   :  { %130 = vst [vmem:[#allocation8 + $0x10] sm:$0xff] %v109_v36 }
  0x5f   :  { %223 = shalt.err (!%p220_p0)
}
  0x60   :  { %142 = dma.vmem_to_hbm [thread:$0]  %s137_s1, 384, %s278_s2, [#allocation5], %s239_s12, %s239_s12, %s240_s13  }
  0x61   :  { %236 = dma.done.wait [#allocation5], 384  }
  0x62   :  { %237 = vsyncadd [#allocation5], 4294966912 }
  0x63   :  { %146 = vsyncpa [#allocation4], 1 }
  0x64   :  { %147 = vsyncpa [#allocation7], 1 }
  0x65   :  { %148 = vsyncpa [#allocation5], 1 }

</bundles_post_ra>
